<compile_context>
chip_gen: v7x
topology: tpu7x:2x2x1
jax: 0.10.0
libtpu: 0.0.40
codegen_flags: <defaults>
</compile_context>

<pallas_src>
import jax
import jax.numpy as jnp
from jax.experimental import pallas as pl
from jax.experimental.pallas import tpu as pltpu

IN_FEATURES = 3 * 32 * 32   # 3072
HIDDEN = 128
OUT = 10
OUT_PAD = 128               # lane-dense padded class dimension
TM_MAX = 256                # batch rows per grid step
NEG_PAD = -1e30             # bias baked into padded class lanes (kills them in softmax)


def fc_net_kernel(x_ref, w1_ref, b1_ref, w2_ref, b2_ref, o_ref):
    # Stream f32 x, cast to bf16 in-kernel (VPU, hidden under the x DMA).
    x_bf = x_ref[...].astype(jnp.bfloat16)

    # fc1: [tm, 3072] bf16 @ [3072, 128] bf16 -> f32 accumulation on the MXU.
    h = jnp.dot(x_bf, w1_ref[...], preferred_element_type=jnp.float32)
    h = jnp.maximum(h + b1_ref[...], 0.0)                        # bias + ReLU (f32)

    # fc2: [tm, 128] @ [128, 128] (zero-padded 10 -> 128 lanes) + bias, f32.
    # Padded lanes get bias NEG_PAD, so they contribute exp(~-1e30) = 0 below.
    logits = jnp.dot(h, w2_ref[...], preferred_element_type=jnp.float32)
    logits = logits + b2_ref[...]

    # Numerically stable log_softmax over the class (lane) axis.
    m = jnp.max(logits, axis=-1, keepdims=True)
    shifted = logits - m
    lse = jnp.log(jnp.sum(jnp.exp(shifted), axis=-1, keepdims=True))
    o_ref[...] = (shifted - lse).astype(o_ref.dtype)             # lane-dense [tm,128] store


def prepare_params(w1, b1, w2, b2):
    """One-time weight repack (call OUTSIDE the hot loop):
       - transpose to [in, out] so both layers are plain X @ W matmuls,
       - cast the large fc1 weight to bf16 (matches bf16-cast x in the kernel),
       - zero-pad fc2 weight 10 -> 128 lanes and put a large-negative bias in
         the padded lanes so no in-kernel masking is needed."""
    w1_t = w1.T.astype(jnp.bfloat16)                                    # [3072, 128] bf16
    b1_2d = b1.reshape(1, HIDDEN).astype(jnp.float32)                   # [1, 128]    f32
    w2_t = jnp.zeros((HIDDEN, OUT_PAD), jnp.float32).at[:, :OUT].set(
        w2.T.astype(jnp.float32))                                       # [128, 128]  f32
    b2_2d = jnp.full((1, OUT_PAD), NEG_PAD, jnp.float32).at[:, :OUT].set(
        b2.astype(jnp.float32))                                         # [1, 128]    f32
    return w1_t, b1_2d, w2_t, b2_2d


@jax.jit
def fc_net_forward(x, w1_t, b1_2d, w2_t, b2_2d):
    """x: [B, 3, 32, 32] float32; params from prepare_params. Returns [B, 10] log-probs."""
    B = x.shape[0]
    x_flat = x.reshape(B, IN_FEATURES)          # contiguous view; no extra HBM pass

    # Block over batch. If B <= TM_MAX the block equals the full batch dim
    # (always legal); otherwise tm=256 (multiple of 8) and Pallas masks the
    # partial trailing block.
    tm = min(TM_MAX, B)
    grid = (pl.cdiv(B, tm),)

    out = pl.pallas_call(
        fc_net_kernel,
        out_shape=jax.ShapeDtypeStruct((B, OUT_PAD), jnp.float32),
        grid=grid,
        in_specs=[
            pl.BlockSpec((tm, IN_FEATURES), lambda i: (i, 0)),      # x: streamed per tile (f32)
            pl.BlockSpec((IN_FEATURES, HIDDEN), lambda i: (0, 0)),  # w1: resident (bf16)
            pl.BlockSpec((1, HIDDEN), lambda i: (0, 0)),            # b1: resident
            pl.BlockSpec((HIDDEN, OUT_PAD), lambda i: (0, 0)),      # w2 (padded): resident
            pl.BlockSpec((1, OUT_PAD), lambda i: (0, 0)),           # b2 (padded): resident
        ],
        out_specs=pl.BlockSpec((tm, OUT_PAD), lambda i: (i, 0)),
        compiler_params=pltpu.CompilerParams(
            dimension_semantics=("parallel",),                      # shard batch across TCs (v7x)
        ),
    )(x_flat, w1_t, b1_2d, w2_t, b2_2d)
    return out[:, :OUT]


def init_params(key):
    """Deterministic init mimicking nn.Linear default (uniform +-1/sqrt(fan_in))."""
    k1, k2, k3, k4 = jax.random.split(key, 4)
    bound1 = 1.0 / jnp.sqrt(IN_FEATURES)
    bound2 = 1.0 / jnp.sqrt(HIDDEN)
    w1 = jax.random.uniform(k1, (HIDDEN, IN_FEATURES), jnp.float32, -bound1, bound1)
    b1 = jax.random.uniform(k2, (HIDDEN,), jnp.float32, -bound1, bound1)
    w2 = jax.random.uniform(k3, (OUT, HIDDEN), jnp.float32, -bound2, bound2)
    b2 = jax.random.uniform(k4, (OUT,), jnp.float32, -bound2, bound2)
    return w1, b1, w2, b2


def reference_forward(x, w1, b1, w2, b2):
    """Pure-JAX reference matching the kernel's numerics (bf16-quantized fc1 inputs)."""
    xb = x.reshape(x.shape[0], -1).astype(jnp.bfloat16).astype(jnp.float32)
    w1b = w1.astype(jnp.bfloat16).astype(jnp.float32)
    h = jnp.maximum(xb @ w1b.T + b1, 0.0)
    logits = h @ w2.T + b2
    return jax.nn.log_softmax(logits, axis=1)


if __name__ == "__main__":
    key = jax.random.PRNGKey(0)
    kx, kp = jax.random.split(key)
    x = jax.random.normal(kx, (2, 3, 32, 32), jnp.float32)
    w1, b1, w2, b2 = init_params(kp)

    params = prepare_params(w1, b1, w2, b2)   # one-time repack, not in the hot path
    out = fc_net_forward(x, *params)
    out = jax.block_until_ready(out)

    ref = reference_forward(x, w1, b1, w2, b2)
    assert out.shape == (2, 10)
    assert bool(jnp.all(jnp.isfinite(out))), "non-finite output"
    assert jnp.allclose(out, ref, atol=2e-3, rtol=2e-3), "mismatch vs reference"
    print("KERNEL_OK")
</pallas_src>

<mosaic_0001>
module attributes {stable_mosaic.version = 11 : i64} {
  func.func @fc_net_kernel(%arg0: i32, %arg1: memref<2x3072xf32, #tpu.memory_space<vmem>>, %arg2: memref<3072x128xbf16, #tpu.memory_space<vmem>>, %arg3: memref<1x128xf32, #tpu.memory_space<vmem>>, %arg4: memref<128x128xf32, #tpu.memory_space<vmem>>, %arg5: memref<1x128xf32, #tpu.memory_space<vmem>>, %arg6: memref<2x128xf32, #tpu.memory_space<vmem>>) attributes {dimension_semantics = [#tpu.dimension_semantics<parallel>], iteration_bounds = array<i64: 1>, scalar_prefetch = 0 : i64, scratch_operands = 0 : i64, tpu.core_type = #tpu.core_type<tc>, window_params = [{transform_indices = @transform_0, window_bounds = array<i64: 2, 3072>}, {pipeline_mode = #tpu.pipeline_mode<synchronous>, transform_indices = @transform_1, window_bounds = array<i64: 3072, 128>}, {pipeline_mode = #tpu.pipeline_mode<synchronous>, transform_indices = @transform_2, window_bounds = array<i64: 1, 128>}, {pipeline_mode = #tpu.pipeline_mode<synchronous>, transform_indices = @transform_3, window_bounds = array<i64: 128, 128>}, {pipeline_mode = #tpu.pipeline_mode<synchronous>, transform_indices = @transform_4, window_bounds = array<i64: 1, 128>}, {transform_indices = @transform_5, window_bounds = array<i64: 2, 128>}]} {
    %c0 = arith.constant 0 : index
    %c0_0 = arith.constant 0 : index
    %0 = vector.load %arg1[%c0, %c0_0] : memref<2x3072xf32, #tpu.memory_space<vmem>>, vector<2x3072xf32>
    %1 = arith.truncf %0 : vector<2x3072xf32> to vector<2x3072xbf16>
    %c0_1 = arith.constant 0 : index
    %c0_2 = arith.constant 0 : index
    %2 = vector.load %arg2[%c0_1, %c0_2] : memref<3072x128xbf16, #tpu.memory_space<vmem>>, vector<3072x128xbf16>
    %cst = arith.constant dense<0.000000e+00> : vector<2x128xf32>
    %3 = tpu.matmul %1, %2, %cst {dimension_numbers = #tpu.dot_dimension_numbers<[1], [0], [0], [1], [0, 0, 1, 1], [], []>} : vector<2x3072xbf16>, vector<3072x128xbf16>, vector<2x128xf32> -> vector<2x128xf32>
    %c0_3 = arith.constant 0 : index
    %c0_4 = arith.constant 0 : index
    %4 = vector.load %arg3[%c0_3, %c0_4] : memref<1x128xf32, #tpu.memory_space<vmem>>, vector<1x128xf32>
    %5 = vector.broadcast %4 : vector<1x128xf32> to vector<2x128xf32>
    %6 = arith.addf %3, %5 : vector<2x128xf32>
    %cst_5 = arith.constant 0.000000e+00 : f32
    %7 = vector.broadcast %cst_5 : f32 to vector<2x128xf32>
    %8 = arith.maximumf %6, %7 : vector<2x128xf32>
    %c0_6 = arith.constant 0 : index
    %c0_7 = arith.constant 0 : index
    %9 = vector.load %arg4[%c0_6, %c0_7] : memref<128x128xf32, #tpu.memory_space<vmem>>, vector<128x128xf32>
    %cst_8 = arith.constant dense<0.000000e+00> : vector<2x128xf32>
    %10 = tpu.matmul %8, %9, %cst_8 {dimension_numbers = #tpu.dot_dimension_numbers<[1], [0], [0], [1], [0, 0, 1, 1], [], []>} : vector<2x128xf32>, vector<128x128xf32>, vector<2x128xf32> -> vector<2x128xf32>
    %c0_9 = arith.constant 0 : index
    %c0_10 = arith.constant 0 : index
    %11 = vector.load %arg5[%c0_9, %c0_10] : memref<1x128xf32, #tpu.memory_space<vmem>>, vector<1x128xf32>
    %12 = vector.broadcast %11 : vector<1x128xf32> to vector<2x128xf32>
    %13 = arith.addf %10, %12 : vector<2x128xf32>
    %cst_11 = arith.constant dense<0xFF800000> : vector<2xf32>
    %14 = vector.multi_reduction <maximumf>, %13, %cst_11 [1] : vector<2x128xf32> to vector<2xf32>
    %15 = vector.shape_cast %14 : vector<2xf32> to vector<2x1xf32>
    %16 = vector.broadcast %15 : vector<2x1xf32> to vector<2x128xf32>
    %17 = arith.subf %13, %16 : vector<2x128xf32>
    %18 = math.exp %17 : vector<2x128xf32>
    %cst_12 = arith.constant dense<0.000000e+00> : vector<2xf32>
    %19 = vector.multi_reduction <add>, %18, %cst_12 [1] : vector<2x128xf32> to vector<2xf32>
    %20 = vector.shape_cast %19 : vector<2xf32> to vector<2x1xf32>
    %21 = math.log %20 : vector<2x1xf32>
    %22 = vector.broadcast %21 : vector<2x1xf32> to vector<2x128xf32>
    %23 = arith.subf %17, %22 : vector<2x128xf32>
    %c0_13 = arith.constant 0 : index
    %c0_14 = arith.constant 0 : index
    %24 = vector.load %arg6[%c0_13, %c0_14] : memref<2x128xf32, #tpu.memory_space<vmem>>, vector<2x128xf32>
    tpu.vector_store %arg6[%c0_13, %c0_14], %23 {strides = array<i32>} : memref<2x128xf32, #tpu.memory_space<vmem>>, vector<2x128xf32>,
    return
  }
  func.func @transform_0(%arg0: i32) -> (i32, i32) {
    %c0_i32 = arith.constant 0 : i32
    %c0_i32_0 = arith.constant 0 : i32
    return %arg0, %c0_i32 : i32, i32
  }
  func.func @transform_1(%arg0: i32) -> (i32, i32) {
    %c0_i32 = arith.constant 0 : i32
    %c0_i32_0 = arith.constant 0 : i32
    %c0_i32_1 = arith.constant 0 : i32
    return %c0_i32, %c0_i32_0 : i32, i32
  }
  func.func @transform_2(%arg0: i32) -> (i32, i32) {
    %c0_i32 = arith.constant 0 : i32
    %c0_i32_0 = arith.constant 0 : i32
    %c0_i32_1 = arith.constant 0 : i32
    return %c0_i32, %c0_i32_0 : i32, i32
  }
  func.func @transform_3(%arg0: i32) -> (i32, i32) {
    %c0_i32 = arith.constant 0 : i32
    %c0_i32_0 = arith.constant 0 : i32
    %c0_i32_1 = arith.constant 0 : i32
    return %c0_i32, %c0_i32_0 : i32, i32
  }
  func.func @transform_4(%arg0: i32) -> (i32, i32) {
    %c0_i32 = arith.constant 0 : i32
    %c0_i32_0 = arith.constant 0 : i32
    %c0_i32_1 = arith.constant 0 : i32
    return %c0_i32, %c0_i32_0 : i32, i32
  }
  func.func @transform_5(%arg0: i32) -> (i32, i32) {
    %c0_i32 = arith.constant 0 : i32
    %c0_i32_0 = arith.constant 0 : i32
    return %arg0, %c0_i32 : i32, i32
  }
}

</mosaic_0001>

<bundles_post_ra>
// kernel: fc_net_forward.1
= control target key start
LH: loop header
LB: loop body
LE: loop exit
PB: predicated region body
PF: predicated region fallthrough
CT: control target
= control target key end

     0   :  { %10 = vsyncpa [#allocation3], 0  ;;  %s3284_s0 = inlined_call_operand.vmem [shape: f32[2,3072], index: 0, kind: input, shape index: {}]   ;;  %s3285_s1 = inlined_call_operand.hbm [shape: bf16[3072,128], index: 1, kind: input, shape index: {}]   ;;  %s3286_s2 = inlined_call_operand.vmem [shape: f32[1,128], index: 2, kind: input, shape index: {}]   ;;  %s3287_s3 = inlined_call_operand.vmem [shape: f32[128,128], index: 3, kind: input, shape index: {}]   ;;  %s3288_s4 = inlined_call_operand.vmem [shape: f32[1,128], index: 4, kind: input, shape index: {}]   ;;  %s3289_s5 = inlined_call_operand.hbm [shape: f32[2,128], index: 5, kind: output, shape index: {}]  }
   0x1   :  { %11 = vsyncpa [#allocation4], 0  ;;  %s3136_s18 = smov [#allocation2]   ;;  %s3088_s22 = scalar_lea.hbm %s3285_s1, 24576 }
   0x2   :  { %s19_s19 = sshll.u32 %s3136_s18, 4  ;;  %p3089_p0 = scmp.ne.s32.totalorder %s3285_s1, %s3088_s22  ;;  %s20_s19 = int_to_ptr.vmem [resolvable:$true] %s19_s19 }
   0x3   :  { %p3092_p1 = scmp.lt.u32.totalorder %s3088_s22, %s3285_s1 }
   0x5   :  { %p3094_p2 = pnand %p3092_p1, %p3089_p0 }
   0x7   :  { %3097 = shalt.err (!%p3094_p2)
}
   0x8   :  { %s3098_s27 = scalar_lea.vmem %s20_s19, 24576  ;;  %p3103_p4 = scmp.lt.s32.totalorder %s20_s19, %s20_s19 }
   0x9   :  { %p3099_p3 = scmp.ne.s32.totalorder %s20_s19, %s3098_s27  ;;  %p3104_p5 = scmp.lt.s32.totalorder %s3098_s27, %s3098_s27 }
   0xb   :  { %p3105_p6 = por %p3104_p5, %p3103_p4 }
   0xd   :  { %p3106_p7 = pnand %p3105_p6, %p3099_p3 }
   0xf   :  { %3109 = shalt.err (!%p3106_p7)
}
  0x10   :  { %s3137_s28 = smov 64   ;;  %s3138_s29 = smov 4  }
  0x11   :  { %25 = dma.hbm_to_vmem [thread:$0]  %s3285_s1, 24576, %s20_s19, [#allocation3], %s3137_s28, %s3137_s28, %s3138_s29  }
  0x12   :  { %3132 = dma.done.wait [#allocation3], 24576  }
  0x13   :  { %3133 = vsyncadd [#allocation3], 4294942720  ;;  %v2886_v0 = vld [vmem:[#allocation2 + $0x40] sm:$0xff]   ;;  %v2890_v4 = vld [vmem:[#allocation2 + $0x48] sm:$0xff]   ;;  %v3139_v22 = vmov 1983009808   ;;  %v52_v24 = vlaneseq }
  0x14   :  { %v2887_v1 = vld [vmem:[#allocation2 + $0xc0] sm:$0xff]   ;;  %2538 = vmatprep.subr.bf16.mxu0 %v2886_v0  ;;  %v2891_v5 = vld [vmem:[#allocation2 + $0xc8] sm:$0xff]   ;;  %v2894_v8 = vld [vmem:[#allocation2 + $0x50] sm:$0xff]   ;;  %v50_v23 = vunpack.c.l.s4 %v3139_v22  ;;  %vm3141_vm0 = vmmov 0   ;;  %vm2315_vm1 = vcmask 1041408   ;;  %s3143_s23 = smov [#allocation5]  }
  0x15   :  { %v2888_v2 = vld [vmem:[#allocation2] sm:$0xff]   ;;  %2560 = vmatprep.subr.bf16.mxu1 %v2887_v1  ;;  %v2892_v6 = vld [vmem:[#allocation2 + $0x8] sm:$0xff]   ;;  %v2895_v9 = vld [vmem:[#allocation2 + $0xd0] sm:$0xff]   ;;  %v53_v30 = vshrl.u32 %v52_v24, 7  ;;  %s2335_s24 = sshll.u32 %s3143_s23, 4  ;;  %s2336_s24 = int_to_ptr.vmem [resolvable:$true] %s2335_s24 }
  0x16   :  { %v2889_v3 = vld [vmem:[#allocation2 + $0x80] sm:$0xff]   ;;  %2539 = vmatpush3.bf16.msra.mxu0 %v2888_v2  ;;  %v2893_v7 = vld [vmem:[#allocation2 + $0x88] sm:$0xff]   ;;  %v2896_v10 = vld [vmem:[#allocation2 + $0x10] sm:$0xff]   ;;  %v51_v29 = vunpack.c.0.s8 %v50_v23  ;;  %p3115_p9 = scmp.lt.s32.totalorder %s2336_s24, %s2336_s24 }
  0x17   :  { %2561 = vmatpush3.bf16.msra.mxu1 %v2889_v3  ;;  %2540 = vmatprep.subr.bf16.mxu0 %v2890_v4  ;;  %v2897_v11 = vld [vmem:[#allocation2 + $0x90] sm:$0xff]   ;;  %v2898_v12 = vld [vmem:[#allocation2 + $0x58] sm:$0xff]   ;;  %v2902_v16 = vld [vmem:[#allocation2 + $0x60] sm:$0xff]  }
  0x18   :  { %2562 = vmatprep.subr.bf16.mxu1 %v2891_v5  ;;  %v2899_v13 = vld [vmem:[#allocation2 + $0xd8] sm:$0xff]   ;;  %v2903_v17 = vld [vmem:[#allocation2 + $0xe0] sm:$0xff]   ;;  %v2906_v20 = vld [vmem:[#allocation2 + $0x68] sm:$0xff]   ;;  %v3186_v35 = vsub.s32 %v51_v29, %v53_v30 }
  0x19   :  { %v2900_v14 = vld [vmem:[#allocation2 + $0x18] sm:$0xff]   ;;  %v2904_v18 = vld [vmem:[#allocation2 + $0x20] sm:$0xff]   ;;  %v2907_v21 = vld [vmem:[#allocation2 + $0xe8] sm:$0xff]  }
  0x1a   :  { %2541 = vmatpush3.bf16.msra.mxu0 %v2892_v6  ;;  %v2901_v15 = vld [vmem:[#allocation2 + $0x98] sm:$0xff]   ;;  %v2905_v19 = vld [vmem:[#allocation2 + $0xa0] sm:$0xff]   ;;  %v2908_v25 = vld [vmem:[#allocation2 + $0x28] sm:$0xff]  }
  0x1b   :  { %2563 = vmatpush3.bf16.msra.mxu1 %v2893_v7  ;;  %2542 = vmatprep.subr.bf16.mxu0 %v2894_v8  ;;  %v2909_v26 = vld [vmem:[#allocation2 + $0xa8] sm:$0xff]   ;;  %v2910_v27 = vld [vmem:[#allocation2 + $0x70] sm:$0xff]   ;;  %v2914_v33 = vld [vmem:[#allocation2 + $0x78] sm:$0xff]  }
  0x1c   :  { %2564 = vmatprep.subr.bf16.mxu1 %v2895_v9  ;;  %v2911_v28 = vld [vmem:[#allocation2 + $0xf0] sm:$0xff]   ;;  %v2915_v34 = vld [vmem:[#allocation2 + $0xf8] sm:$0xff]   ;;  %v2919_v41 = vld [vmem:[#allocation2 + $0x140] sm:$0xff]  }
  0x1d   :  { %v2912_v31 = vld [vmem:[#allocation2 + $0x30] sm:$0xff]   ;;  %v2916_v36 = vld [vmem:[#allocation2 + $0x38] sm:$0xff]   ;;  %v2920_v42 = vld [vmem:[#allocation2 + $0x1c0] sm:$0xff]  }
  0x1e   :  { %2543 = vmatpush3.bf16.msra.mxu0 %v2896_v10  ;;  %v2913_v32 = vld [vmem:[#allocation2 + $0xb0] sm:$0xff]   ;;  %v2917_v37 = vld [vmem:[#allocation2 + $0xb8] sm:$0xff]   ;;  %v2921_v46 = vld [vmem:[#allocation2 + $0x100] sm:$0xff]  }
  0x1f   :  { %2565 = vmatpush3.bf16.msra.mxu1 %v2897_v11  ;;  %2544 = vmatprep.subr.bf16.mxu0 %v2898_v12  ;;  %v36_v38 = vld [vmem:[%s3284_s0] sm:$0xff]  ;;  %v2922_v49 = vld [vmem:[#allocation2 + $0x180] sm:$0xff]   ;;  %v2923_v51 = vld [vmem:[#allocation2 + $0x148] sm:$0xff]  }
  0x20   :  { %2566 = vmatprep.subr.bf16.mxu1 %v2899_v13  ;;  %v55_v39 = vrot.slane %v36_v38, %v3186_v35  ;;  %v48_v40 = vcombine.high %v36_v38, %v36_v38  ;;  %v2924_v53 = vld [vmem:[#allocation2 + $0x1c8] sm:$0xff]   ;;  %v2927_v56 = vld [vmem:[#allocation2 + $0x150] sm:$0xff]   ;;  %v2931_v60 = vld [vmem:[#allocation2 + $0x158] sm:$0xff]  }
  0x21   :  { %v2925_v54 = vld [vmem:[#allocation2 + $0x108] sm:$0xff]   ;;  %v2928_v57 = vld [vmem:[#allocation2 + $0x1d0] sm:$0xff]   ;;  %v2932_v61 = vld [vmem:[#allocation2 + $0x1d8] sm:$0xff]  }
  0x22   :  { %2545 = vmatpush3.bf16.msra.mxu0 %v2900_v14  ;;  %v63_v43 = vcombine.high %v55_v39, %v55_v39  ;;  %v62_v44 = vrot.slane %v48_v40, %v3186_v35  ;;  %v174_v45 = vpack.c.bf16 %v55_v39, %v55_v39  ;;  %v2926_v55 = vld [vmem:[#allocation2 + $0x188] sm:$0xff]   ;;  %v2929_v58 = vld [vmem:[#allocation2 + $0x110] sm:$0xff]   ;;  %v2933_v62 = vld [vmem:[#allocation2 + $0x118] sm:$0xff]  }
  0x23   :  { %2567 = vmatpush3.bf16.msra.mxu1 %v2901_v15  ;;  %2546 = vmatprep.subr.bf16.mxu0 %v2902_v16  ;;  %v2930_v59 = vld [vmem:[#allocation2 + $0x190] sm:$0xff]   ;;  %v2934_v63 = vld [vmem:[#allocation2 + $0x198] sm:$0xff]   ;;  %v2935_v0 = vld [vmem:[#allocation2 + $0x160] sm:$0xff]  }
  0x24   :  { %2568 = vmatprep.subr.bf16.mxu1 %v2903_v17  ;;  %v175_v47 = vpack.c.bf16 %v63_v43, %v63_v43  ;;  %v64_v48 = vcombine.high %v62_v44, %v62_v44  ;;  %v176_v50 = vpack.c.bf16 %v62_v44, %v62_v44  ;;  %v2936_v1 = vld [vmem:[#allocation2 + $0x1e0] sm:$0xff]   ;;  %v2939_v4 = vld [vmem:[#allocation2 + $0x168] sm:$0xff]   ;;  %v2943_v8 = vld [vmem:[#allocation2 + $0x170] sm:$0xff]  }
  0x25   :  { %v2937_v2 = vld [vmem:[#allocation2 + $0x120] sm:$0xff]   ;;  %v2940_v5 = vld [vmem:[#allocation2 + $0x1e8] sm:$0xff]   ;;  %v2944_v9 = vld [vmem:[#allocation2 + $0x1f0] sm:$0xff]  }
  0x26   :  { %2547 = vmatpush3.bf16.msra.mxu0 %v2904_v18  ;;  %1773 = vmatprep.mubr.bf16.mxu0 %v175_v47  ;;  %v177_v52 = vpack.c.bf16 %v64_v48, %v64_v48  ;;  %v2938_v3 = vld [vmem:[#allocation2 + $0x1a0] sm:$0xff]   ;;  %v2941_v6 = vld [vmem:[#allocation2 + $0x128] sm:$0xff]   ;;  %v2945_v10 = vld [vmem:[#allocation2 + $0x130] sm:$0xff]  }
  0x27   :  { %2569 = vmatpush3.bf16.msra.mxu1 %v2905_v19  ;;  %2548 = vmatprep.subr.bf16.mxu0 %v2906_v20  ;;  %v2942_v7 = vld [vmem:[#allocation2 + $0x1a8] sm:$0xff]   ;;  %v2946_v11 = vld [vmem:[#allocation2 + $0x1b0] sm:$0xff]   ;;  %v2947_v12 = vld [vmem:[#allocation2 + $0x178] sm:$0xff]  }
  0x28   :  { %2570 = vmatprep.subr.bf16.mxu1 %v2907_v21  ;;  %1813 = vmatprep.mubr.bf16.mxu1 %v177_v52  ;;  %v2948_v13 = vld [vmem:[#allocation2 + $0x1f8] sm:$0xff]   ;;  %v2952_v19 = vld [vmem:[#allocation2 + $0x240] sm:$0xff]   ;;  %v2956_v29 = vld [vmem:[#allocation2 + $0x248] sm:$0xff]  }
  0x29   :  { %v2949_v14 = vld [vmem:[#allocation2 + $0x138] sm:$0xff]   ;;  %v2953_v22 = vld [vmem:[#allocation2 + $0x2c0] sm:$0xff]   ;;  %v2963_v38 = vld [vmem:[#allocation2 + $0x290] sm:$0xff]  }
  0x2a   :  { %2549 = vmatpush3.bf16.msra.mxu0 %v2908_v25  ;;  %v37_v15 = vld [vmem:[%s3284_s0 + $0x8] sm:$0xff]  ;;  %v2954_v24 = vld [vmem:[#allocation2 + $0x200] sm:$0xff]   ;;  %v2972_v47 = vld [vmem:[#allocation2 + $0x268] sm:$0xff]  }
  0x2b   :  { %2571 = vmatpush3.bf16.msra.mxu1 %v2909_v26  ;;  %2550 = vmatprep.subr.bf16.mxu0 %v2910_v27  ;;  %v2950_v16 = vld [vmem:[#allocation2 + $0x1b8] sm:$0xff]   ;;  %v72_v17 = vrot.slane %v37_v15, %v3186_v35  ;;  %v65_v18 = vcombine.high %v37_v15, %v37_v15  ;;  %v2955_v27 = vld [vmem:[#allocation2 + $0x280] sm:$0xff]   ;;  %v2973_v48 = vld [vmem:[#allocation2 + $0x2e8] sm:$0xff]  }
  0x2c   :  { %2572 = vmatprep.subr.bf16.mxu1 %v2911_v28  ;;  %v2964_v39 = vld [vmem:[#allocation2 + $0x258] sm:$0xff]   ;;  %v2968_v43 = vld [vmem:[#allocation2 + $0x260] sm:$0xff]   ;;  %v2977_v52 = vld [vmem:[#allocation2 + $0x2f0] sm:$0xff]  }
  0x2d   :  { %v80_v20 = vcombine.high %v72_v17, %v72_v17  ;;  %v79_v21 = vrot.slane %v65_v18, %v3186_v35  ;;  %v178_v23 = vpack.c.bf16 %v72_v17, %v72_v17  ;;  %v2965_v40 = vld [vmem:[#allocation2 + $0x2d8] sm:$0xff]   ;;  %v2969_v44 = vld [vmem:[#allocation2 + $0x2e0] sm:$0xff]   ;;  %v2995_v15 = vld [vmem:[#allocation2 + $0x310] sm:$0xff]  }
  0x2e   :  { %2551 = vmatpush3.bf16.msra.mxu0 %v2912_v31  ;;  %v2957_v31 = vld [vmem:[#allocation2 + $0x2c8] sm:$0xff]   ;;  %v2997_v17 = vld [vmem:[#allocation2 + $0x358] sm:$0xff]  }
  0x2f   :  { %2573 = vmatpush3.bf16.msra.mxu1 %v2913_v32  ;;  %2552 = vmatprep.subr.bf16.mxu0 %v2914_v33  ;;  %v179_v25 = vpack.c.bf16 %v80_v20, %v80_v20  ;;  %v81_v26 = vcombine.high %v79_v21, %v79_v21  ;;  %v180_v28 = vpack.c.bf16 %v79_v21, %v79_v21  ;;  %v2958_v32 = vld [vmem:[#allocation2 + $0x208] sm:$0xff]   ;;  %v2998_v18 = vld [vmem:[#allocation2 + $0x3d8] sm:$0xff]   ;;  %v3001_v21 = vld [vmem:[#allocation2 + $0x360] sm:$0xff]  }
  0x30   :  { %2574 = vmatprep.subr.bf16.mxu1 %v2915_v34  ;;  %v2959_v33 = vld [vmem:[#allocation2 + $0x288] sm:$0xff]   ;;  %v2960_v34 = vld [vmem:[#allocation2 + $0x250] sm:$0xff]   ;;  %v3000_v20 = vld [vmem:[#allocation2 + $0x398] sm:$0xff]  }
  0x31   :  { %v181_v30 = vpack.c.bf16 %v81_v26, %v81_v26  ;;  %v3006_v26 = vld [vmem:[#allocation2 + $0x3e8] sm:$0xff]  }
  0x32   :  { %2553 = vmatpush3.bf16.msra.mxu0 %v2916_v36  ;;  %v2961_v36 = vld [vmem:[#allocation2 + $0x2d0] sm:$0xff]  }
  0x33   :  { %2575 = vmatpush3.bf16.msra.mxu1 %v2917_v37  ;;  %2582 = vmatprep.subr.bf16.mxu0 %v2919_v41  ;;  %v2962_v37 = vld [vmem:[#allocation2 + $0x210] sm:$0xff]   ;;  %v2966_v41 = vld [vmem:[#allocation2 + $0x218] sm:$0xff]  }
  0x34   :  { %2604 = vmatprep.subr.bf16.mxu1 %v2920_v42  ;;  %v2967_v42 = vld [vmem:[#allocation2 + $0x298] sm:$0xff]  }
  0x35   :  { %1774 = vmatmul.mubr.bf16.vlgmr.msra.gmra.mrb[0].mxu0 %v174_v45  ;;  %v2970_v45 = vld [vmem:[#allocation2 + $0x220] sm:$0xff]  }
  0x36   :  { %2583 = vmatpush3.bf16.msra.mxu0 %v2921_v46  ;;  %1814 = vmatmul.mubr.bf16.vlgmr.msra.gmra.mrb[0].mxu1 %v176_v50  ;;  %v2971_v46 = vld [vmem:[#allocation2 + $0x2a0] sm:$0xff]   ;;  %v2975_v50 = vld [vmem:[#allocation2 + $0x2a8] sm:$0xff]  }
  0x37   :  { %2584 = vmatprep.subr.bf16.mxu0 %v2923_v51  ;;  %2605 = vmatpush3.bf16.msra.mxu1 %v2922_v49  ;;  %v2974_v49 = vld [vmem:[#allocation2 + $0x228] sm:$0xff]   ;;  %v2976_v51 = vld [vmem:[#allocation2 + $0x270] sm:$0xff]  }
  0x38   :  { %2606 = vmatprep.subr.bf16.mxu1 %v2924_v53  ;;  %1853 = vmatprep.mubr.bf16.mxu0 %v179_v25  ;;  %v2978_v53 = vld [vmem:[#allocation2 + $0x230] sm:$0xff]   ;;  %v3005_v25 = vld [vmem:[#allocation2 + $0x368] sm:$0xff]  }
  0x39   :  { %1893 = vmatprep.mubr.bf16.mxu1 %v181_v30  ;;  %v3010_v30 = vld [vmem:[#allocation2 + $0x3f0] sm:$0xff]  }
  0x3a   :  { %2585 = vmatpush3.bf16.msra.mxu0 %v2925_v54  ;;  %v2979_v54 = vld [vmem:[#allocation2 + $0x2b0] sm:$0xff]  }
  0x3b   :  { %2586 = vmatprep.subr.bf16.mxu0 %v2927_v56  ;;  %2607 = vmatpush3.bf16.msra.mxu1 %v2926_v55  ;;  %v2980_v55 = vld [vmem:[#allocation2 + $0x278] sm:$0xff]  }
  0x3c   :  { %2608 = vmatprep.subr.bf16.mxu1 %v2928_v57  ;;  %v2981_v56 = vld [vmem:[#allocation2 + $0x2f8] sm:$0xff]  }
  0x3d   :  { %v2982_v57 = vld [vmem:[#allocation2 + $0x238] sm:$0xff]  }
  0x3e   :  { %2587 = vmatpush3.bf16.msra.mxu0 %v2929_v58  ;;  %v38_v58 = vld [vmem:[%s3284_s0 + $0x10] sm:$0xff] }
  0x3f   :  { %2588 = vmatprep.subr.bf16.mxu0 %v2931_v60  ;;  %2609 = vmatpush3.bf16.msra.mxu1 %v2930_v59  ;;  %v2983_v59 = vld [vmem:[#allocation2 + $0x2b8] sm:$0xff]   ;;  %v89_v60 = vrot.slane %v38_v58, %v3186_v35 }
  0x40   :  { %2610 = vmatprep.subr.bf16.mxu1 %v2932_v61  ;;  %v82_v61 = vcombine.high %v38_v58, %v38_v58  ;;  %v3028_v58 = vld [vmem:[#allocation2 + $0x410] sm:$0xff]  }
  0x42   :  { %2589 = vmatpush3.bf16.msra.mxu0 %v2933_v62  ;;  %v2985_v62 = vld [vmem:[#allocation2 + $0x340] sm:$0xff]  }
  0x43   :  { %2590 = vmatprep.subr.bf16.mxu0 %v2935_v0  ;;  %2611 = vmatpush3.bf16.msra.mxu1 %v2934_v63  ;;  %v97_v63 = vcombine.high %v89_v60, %v89_v60  ;;  %v96_v0 = vrot.slane %v82_v61, %v3186_v35  ;;  %v3031_v61 = vld [vmem:[#allocation2 + $0x4d8] sm:$0xff]  }
  0x44   :  { %2612 = vmatprep.subr.bf16.mxu1 %v2936_v1  ;;  %v2986_v1 = vld [vmem:[#allocation2 + $0x3c0] sm:$0xff]  }
  0x46   :  { %2591 = vmatpush3.bf16.msra.mxu0 %v2937_v2  ;;  %v182_v2 = vpack.c.bf16 %v89_v60, %v89_v60  ;;  %v3029_v60 = vld [vmem:[#allocation2 + $0x490] sm:$0xff]  }
  0x47   :  { %2592 = vmatprep.subr.bf16.mxu0 %v2939_v4  ;;  %2613 = vmatpush3.bf16.msra.mxu1 %v2938_v3  ;;  %v2987_v3 = vld [vmem:[#allocation2 + $0x300] sm:$0xff]   ;;  %v183_v4 = vpack.c.bf16 %v97_v63, %v97_v63 }
  0x48   :  { %2614 = vmatprep.subr.bf16.mxu1 %v2940_v5  ;;  %v98_v5 = vcombine.high %v96_v0, %v96_v0  ;;  %v3034_v63 = vld [vmem:[#allocation2 + $0x460] sm:$0xff]  }
  0x4a   :  { %2593 = vmatpush3.bf16.msra.mxu0 %v2941_v6  ;;  %v2988_v6 = vld [vmem:[#allocation2 + $0x380] sm:$0xff]  }
  0x4b   :  { %2594 = vmatprep.subr.bf16.mxu0 %v2943_v8  ;;  %2615 = vmatpush3.bf16.msra.mxu1 %v2942_v7  ;;  %v184_v7 = vpack.c.bf16 %v96_v0, %v96_v0  ;;  %v2989_v8 = vld [vmem:[#allocation2 + $0x348] sm:$0xff]   ;;  %v3033_v0 = vld [vmem:[#allocation2 + $0x498] sm:$0xff]  }
  0x4c   :  { %2616 = vmatprep.subr.bf16.mxu1 %v2944_v9  ;;  %v185_v9 = vpack.c.bf16 %v98_v5, %v98_v5  ;;  %v3039_v5 = vld [vmem:[#allocation2 + $0x4e8] sm:$0xff]  }
  0x4e   :  { %2595 = vmatpush3.bf16.msra.mxu0 %v2945_v10  ;;  %v2990_v10 = vld [vmem:[#allocation2 + $0x3c8] sm:$0xff]  }
  0x4f   :  { %2596 = vmatprep.subr.bf16.mxu0 %v2947_v12  ;;  %2617 = vmatpush3.bf16.msra.mxu1 %v2946_v11  ;;  %v2991_v11 = vld [vmem:[#allocation2 + $0x308] sm:$0xff]  }
  0x50   :  { %2618 = vmatprep.subr.bf16.mxu1 %v2948_v13  ;;  %v2992_v12 = vld [vmem:[#allocation2 + $0x388] sm:$0xff]   ;;  %v2993_v13 = vld [vmem:[#allocation2 + $0x350] sm:$0xff]  }
  0x52   :  { %2597 = vmatpush3.bf16.msra.mxu0 %v2949_v14  ;;  %v2994_v14 = vld [vmem:[#allocation2 + $0x3d0] sm:$0xff]  }
  0x53   :  { %2626 = vmatprep.subr.bf16.mxu0 %v2952_v19  ;;  %2619 = vmatpush3.bf16.msra.mxu1 %v2950_v16  ;;  %v2996_v16 = vld [vmem:[#allocation2 + $0x390] sm:$0xff]   ;;  %v2999_v19 = vld [vmem:[#allocation2 + $0x318] sm:$0xff]  }
  0x54   :  { %2648 = vmatprep.subr.bf16.mxu1 %v2953_v22  ;;  %v3002_v22 = vld [vmem:[#allocation2 + $0x3e0] sm:$0xff]  }
  0x55   :  { %1854 = vmatmul.mubr.bf16.vlgmr.msra.gmra.mrb[4].mxu0 %v178_v23  ;;  %v3003_v23 = vld [vmem:[#allocation2 + $0x320] sm:$0xff]  }
  0x56   :  { %2627 = vmatpush3.bf16.msra.mxu0 %v2954_v24  ;;  %1894 = vmatmul.mubr.bf16.vlgmr.msra.gmra.mrb[4].mxu1 %v180_v28  ;;  %v3004_v24 = vld [vmem:[#allocation2 + $0x3a0] sm:$0xff]   ;;  %v3008_v28 = vld [vmem:[#allocation2 + $0x3a8] sm:$0xff]  }
  0x57   :  { %2628 = vmatprep.subr.bf16.mxu0 %v2956_v29  ;;  %2649 = vmatpush3.bf16.msra.mxu1 %v2955_v27  ;;  %v3007_v27 = vld [vmem:[#allocation2 + $0x328] sm:$0xff]   ;;  %v3009_v29 = vld [vmem:[#allocation2 + $0x370] sm:$0xff]  }
  0x58   :  { %2650 = vmatprep.subr.bf16.mxu1 %v2957_v31  ;;  %1933 = vmatprep.mubr.bf16.mxu0 %v183_v4  ;;  %v3011_v31 = vld [vmem:[#allocation2 + $0x330] sm:$0xff]   ;;  %v3037_v4 = vld [vmem:[#allocation2 + $0x4a0] sm:$0xff]  }
  0x59   :  { %1973 = vmatprep.mubr.bf16.mxu1 %v185_v9  ;;  %v3043_v9 = vld [vmem:[#allocation2 + $0x4f0] sm:$0xff]  }
  0x5a   :  { %2629 = vmatpush3.bf16.msra.mxu0 %v2958_v32  ;;  %v3012_v32 = vld [vmem:[#allocation2 + $0x3b0] sm:$0xff]  }
  0x5b   :  { %2630 = vmatprep.subr.bf16.mxu0 %v2960_v34  ;;  %2651 = vmatpush3.bf16.msra.mxu1 %v2959_v33  ;;  %v3013_v33 = vld [vmem:[#allocation2 + $0x378] sm:$0xff]  }
  0x5c   :  { %2652 = vmatprep.subr.bf16.mxu1 %v2961_v36  ;;  %v3014_v34 = vld [vmem:[#allocation2 + $0x3f8] sm:$0xff]  }
  0x5d   :  { %v3015_v36 = vld [vmem:[#allocation2 + $0x338] sm:$0xff]  }
  0x5e   :  { %2631 = vmatpush3.bf16.msra.mxu0 %v2962_v37  ;;  %v39_v37 = vld [vmem:[%s3284_s0 + $0x18] sm:$0xff] }
  0x5f   :  { %2632 = vmatprep.subr.bf16.mxu0 %v2964_v39  ;;  %2653 = vmatpush3.bf16.msra.mxu1 %v2963_v38  ;;  %v106_v38 = vrot.slane %v39_v37, %v3186_v35  ;;  %v99_v39 = vcombine.high %v39_v37, %v39_v37  ;;  %v3061_v37 = vld [vmem:[#allocation2 + $0x510] sm:$0xff]  }
  0x60   :  { %2654 = vmatprep.subr.bf16.mxu1 %v2965_v40  ;;  %v3018_v40 = vld [vmem:[#allocation2 + $0x440] sm:$0xff]  }
  0x62   :  { %2633 = vmatpush3.bf16.msra.mxu0 %v2966_v41  ;;  %v3016_v41 = vld [vmem:[#allocation2 + $0x3b8] sm:$0xff]  }
  0x63   :  { %2634 = vmatprep.subr.bf16.mxu0 %v2968_v43  ;;  %2655 = vmatpush3.bf16.msra.mxu1 %v2967_v42  ;;  %v114_v42 = vcombine.high %v106_v38, %v106_v38  ;;  %v113_v43 = vrot.slane %v99_v39, %v3186_v35  ;;  %v3062_v39 = vld [vmem:[#allocation2 + $0x590] sm:$0xff]  }
  0x64   :  { %2656 = vmatprep.subr.bf16.mxu1 %v2969_v44  ;;  %v3019_v44 = vld [vmem:[#allocation2 + $0x4c0] sm:$0xff]  }
  0x66   :  { %2635 = vmatpush3.bf16.msra.mxu0 %v2970_v45  ;;  %v186_v45 = vpack.c.bf16 %v106_v38, %v106_v38  ;;  %v3063_v38 = vld [vmem:[#allocation2 + $0x558] sm:$0xff]  }
  0x67   :  { %2636 = vmatprep.subr.bf16.mxu0 %v2972_v47  ;;  %2657 = vmatpush3.bf16.msra.mxu1 %v2971_v46  ;;  %v187_v46 = vpack.c.bf16 %v114_v42, %v114_v42  ;;  %v115_v47 = vcombine.high %v113_v43, %v113_v43  ;;  %v3067_v42 = vld [vmem:[#allocation2 + $0x560] sm:$0xff]  }
  0x68   :  { %2658 = vmatprep.subr.bf16.mxu1 %v2973_v48  ;;  %v3020_v48 = vld [vmem:[#allocation2 + $0x400] sm:$0xff]  }
  0x6a   :  { %2637 = vmatpush3.bf16.msra.mxu0 %v2974_v49  ;;  %v188_v49 = vpack.c.bf16 %v113_v43, %v113_v43  ;;  %v3066_v43 = vld [vmem:[#allocation2 + $0x598] sm:$0xff]  }
  0x6b   :  { %2638 = vmatprep.subr.bf16.mxu0 %v2976_v51  ;;  %2659 = vmatpush3.bf16.msra.mxu1 %v2975_v50  ;;  %v3022_v50 = vld [vmem:[#allocation2 + $0x448] sm:$0xff]   ;;  %v189_v51 = vpack.c.bf16 %v115_v47, %v115_v47  ;;  %v3070_v47 = vld [vmem:[#allocation2 + $0x5a0] sm:$0xff]  }
  0x6c   :  { %2660 = vmatprep.subr.bf16.mxu1 %v2977_v52  ;;  %v3021_v52 = vld [vmem:[#allocation2 + $0x480] sm:$0xff]  }
  0x6e   :  { %2639 = vmatpush3.bf16.msra.mxu0 %v2978_v53  ;;  %v3023_v53 = vld [vmem:[#allocation2 + $0x4c8] sm:$0xff]  }
  0x6f   :  { %2640 = vmatprep.subr.bf16.mxu0 %v2980_v55  ;;  %2661 = vmatpush3.bf16.msra.mxu1 %v2979_v54  ;;  %v3024_v54 = vld [vmem:[#allocation2 + $0x408] sm:$0xff]   ;;  %v3026_v55 = vld [vmem:[#allocation2 + $0x450] sm:$0xff]  }
  0x70   :  { %2662 = vmatprep.subr.bf16.mxu1 %v2981_v56  ;;  %v3025_v56 = vld [vmem:[#allocation2 + $0x488] sm:$0xff]  }
  0x72   :  { %2641 = vmatpush3.bf16.msra.mxu0 %v2982_v57  ;;  %v3027_v57 = vld [vmem:[#allocation2 + $0x4d0] sm:$0xff]  }
  0x73   :  { %2670 = vmatprep.subr.bf16.mxu0 %v2985_v62  ;;  %2663 = vmatpush3.bf16.msra.mxu1 %v2983_v59  ;;  %v3030_v59 = vld [vmem:[#allocation2 + $0x458] sm:$0xff]  }
  0x74   :  { %2692 = vmatprep.subr.bf16.mxu1 %v2986_v1  ;;  %v3032_v62 = vld [vmem:[#allocation2 + $0x418] sm:$0xff]   ;;  %v3035_v1 = vld [vmem:[#allocation2 + $0x4e0] sm:$0xff]  }
  0x75   :  { %1934 = vmatmul.mubr.bf16.vlgmr.msra.gmra.mrb[8].mxu0 %v182_v2  ;;  %v3036_v2 = vld [vmem:[#allocation2 + $0x420] sm:$0xff]  }
  0x76   :  { %2671 = vmatpush3.bf16.msra.mxu0 %v2987_v3  ;;  %1974 = vmatmul.mubr.bf16.vlgmr.msra.gmra.mrb[8].mxu1 %v184_v7  ;;  %v3038_v3 = vld [vmem:[#allocation2 + $0x468] sm:$0xff]   ;;  %v3042_v7 = vld [vmem:[#allocation2 + $0x470] sm:$0xff]  }
  0x77   :  { %2672 = vmatprep.subr.bf16.mxu0 %v2989_v8  ;;  %2693 = vmatpush3.bf16.msra.mxu1 %v2988_v6  ;;  %v3040_v6 = vld [vmem:[#allocation2 + $0x428] sm:$0xff]  }
  0x78   :  { %2694 = vmatprep.subr.bf16.mxu1 %v2990_v10  ;;  %2013 = vmatprep.mubr.bf16.mxu0 %v187_v46  ;;  %v3041_v8 = vld [vmem:[#allocation2 + $0x4a8] sm:$0xff]   ;;  %v3044_v10 = vld [vmem:[#allocation2 + $0x430] sm:$0xff]  }
  0x79   :  { %2053 = vmatprep.mubr.bf16.mxu1 %v189_v51  ;;  %v3071_v46 = vld [vmem:[#allocation2 + $0x568] sm:$0xff]  }
  0x7a   :  { %2673 = vmatpush3.bf16.msra.mxu0 %v2991_v11  ;;  %v3046_v11 = vld [vmem:[#allocation2 + $0x478] sm:$0xff]   ;;  %v3074_v51 = vld [vmem:[#allocation2 + $0x5a8] sm:$0xff]  }
  0x7b   :  { %2674 = vmatprep.subr.bf16.mxu0 %v2993_v13  ;;  %2695 = vmatpush3.bf16.msra.mxu1 %v2992_v12  ;;  %v3045_v12 = vld [vmem:[#allocation2 + $0x4b0] sm:$0xff]   ;;  %v3047_v13 = vld [vmem:[#allocation2 + $0x4f8] sm:$0xff]  }
  0x7c   :  { %2696 = vmatprep.subr.bf16.mxu1 %v2994_v14  ;;  %v40_v14 = vld [vmem:[%s3284_s0 + $0x20] sm:$0xff] }
  0x7e   :  { %2675 = vmatpush3.bf16.msra.mxu0 %v2995_v15  ;;  %v3048_v15 = vld [vmem:[#allocation2 + $0x438] sm:$0xff]  }
  0x7f   :  { %2676 = vmatprep.subr.bf16.mxu0 %v2997_v17  ;;  %2697 = vmatpush3.bf16.msra.mxu1 %v2996_v16  ;;  %v123_v16 = vrot.slane %v40_v14, %v3186_v35  ;;  %v116_v17 = vcombine.high %v40_v14, %v40_v14 }
  0x80   :  { %2698 = vmatprep.subr.bf16.mxu1 %v2998_v18  ;;  %v3051_v18 = vld [vmem:[#allocation2 + $0x540] sm:$0xff]  }
  0x82   :  { %2677 = vmatpush3.bf16.msra.mxu0 %v2999_v19  ;;  %v3049_v19 = vld [vmem:[#allocation2 + $0x4b8] sm:$0xff]  }
  0x83   :  { %2678 = vmatprep.subr.bf16.mxu0 %v3001_v21  ;;  %2699 = vmatpush3.bf16.msra.mxu1 %v3000_v20  ;;  %v131_v20 = vcombine.high %v123_v16, %v123_v16  ;;  %v130_v21 = vrot.slane %v116_v17, %v3186_v35  ;;  %v2222_v17 = vld [vmem:[%s3287_s3] sm:$0xff] }
  0x84   :  { %2700 = vmatprep.subr.bf16.mxu1 %v3002_v22  ;;  %v190_v22 = vpack.c.bf16 %v123_v16, %v123_v16 }
  0x86   :  { %2679 = vmatpush3.bf16.msra.mxu0 %v3003_v23  ;;  %v3052_v23 = vld [vmem:[#allocation2 + $0x5c0] sm:$0xff]  }
  0x87   :  { %2680 = vmatprep.subr.bf16.mxu0 %v3005_v25  ;;  %2701 = vmatpush3.bf16.msra.mxu1 %v3004_v24  ;;  %v191_v24 = vpack.c.bf16 %v131_v20, %v131_v20  ;;  %v132_v25 = vcombine.high %v130_v21, %v130_v21  ;;  %v3140_v20 = vmov 0.0|0.0  }
  0x88   :  { %2702 = vmatprep.subr.bf16.mxu1 %v3006_v26  ;;  %v3053_v26 = vld [vmem:[#allocation2 + $0x500] sm:$0xff]  }
  0x8a   :  { %2681 = vmatpush3.bf16.msra.mxu0 %v3007_v27  ;;  %v192_v27 = vpack.c.bf16 %v130_v21, %v130_v21 }
  0x8b   :  { %2682 = vmatprep.subr.bf16.mxu0 %v3009_v29  ;;  %2703 = vmatpush3.bf16.msra.mxu1 %v3008_v28  ;;  %v3055_v28 = vld [vmem:[#allocation2 + $0x548] sm:$0xff]   ;;  %v193_v29 = vpack.c.bf16 %v132_v25, %v132_v25  ;;  %v2227_v25 = vld [vmem:[%s3287_s3 + $0x28] sm:$0xff] }
  0x8c   :  { %2704 = vmatprep.subr.bf16.mxu1 %v3010_v30  ;;  %v3054_v30 = vld [vmem:[#allocation2 + $0x580] sm:$0xff]  }
  0x8e   :  { %2683 = vmatpush3.bf16.msra.mxu0 %v3011_v31  ;;  %v3056_v31 = vld [vmem:[#allocation2 + $0x5c8] sm:$0xff]  }
  0x8f   :  { %2684 = vmatprep.subr.bf16.mxu0 %v3013_v33  ;;  %2705 = vmatpush3.bf16.msra.mxu1 %v3012_v32  ;;  %v3057_v32 = vld [vmem:[#allocation2 + $0x508] sm:$0xff]   ;;  %v3059_v33 = vld [vmem:[#allocation2 + $0x550] sm:$0xff]  }
  0x90   :  { %2706 = vmatprep.subr.bf16.mxu1 %v3014_v34  ;;  %v3058_v34 = vld [vmem:[#allocation2 + $0x588] sm:$0xff]  }
  0x92   :  { %2685 = vmatpush3.bf16.msra.mxu0 %v3015_v36  ;;  %v3060_v36 = vld [vmem:[#allocation2 + $0x5d0] sm:$0xff]  }
  0x93   :  { %2714 = vmatprep.subr.bf16.mxu0 %v3018_v40  ;;  %2707 = vmatpush3.bf16.msra.mxu1 %v3016_v41  ;;  %v3064_v40 = vld [vmem:[#allocation2 + $0x5d8] sm:$0xff]  }
  0x94   :  { %2736 = vmatprep.subr.bf16.mxu1 %v3019_v44  ;;  %v3065_v41 = vld [vmem:[#allocation2 + $0x518] sm:$0xff]   ;;  %v3068_v44 = vld [vmem:[#allocation2 + $0x5e0] sm:$0xff]  }
  0x95   :  { %2014 = vmatmul.mubr.bf16.vlgmr.msra.gmra.mrb[12].mxu0 %v186_v45  ;;  %v3069_v45 = vld [vmem:[#allocation2 + $0x520] sm:$0xff]  }
  0x96   :  { %2715 = vmatpush3.bf16.msra.mxu0 %v3020_v48  ;;  %2054 = vmatmul.mubr.bf16.vlgmr.msra.gmra.mrb[12].mxu1 %v188_v49  ;;  %v3072_v48 = vld [vmem:[#allocation2 + $0x5e8] sm:$0xff]  }
  0x97   :  { %2716 = vmatprep.subr.bf16.mxu0 %v3022_v50  ;;  %2737 = vmatpush3.bf16.msra.mxu1 %v3021_v52  ;;  %v3073_v49 = vld [vmem:[#allocation2 + $0x528] sm:$0xff]   ;;  %v3075_v50 = vld [vmem:[#allocation2 + $0x570] sm:$0xff]  }
  0x98   :  { %2738 = vmatprep.subr.bf16.mxu1 %v3023_v53  ;;  %2093 = vmatprep.mubr.bf16.mxu0 %v191_v24  ;;  %v3076_v52 = vld [vmem:[#allocation2 + $0x5f0] sm:$0xff]  }
  0x99   :  { %2133 = vmatprep.mubr.bf16.mxu1 %v193_v29  ;;  %v3077_v53 = vld [vmem:[#allocation2 + $0x530] sm:$0xff]  }
  0x9a   :  { %2717 = vmatpush3.bf16.msra.mxu0 %v3024_v54  ;;  %v3079_v54 = vld [vmem:[#allocation2 + $0x578] sm:$0xff]   ;;  %v2226_v24 = vld [vmem:[%s3287_s3 + $0x20] sm:$0xff] }
  0x9b   :  { %2718 = vmatprep.subr.bf16.mxu0 %v3026_v55  ;;  %2739 = vmatpush3.bf16.msra.mxu1 %v3025_v56  ;;  %v3078_v55 = vld [vmem:[#allocation2 + $0x5b0] sm:$0xff]   ;;  %v3080_v56 = vld [vmem:[#allocation2 + $0x5f8] sm:$0xff]  }
  0x9c   :  { %2740 = vmatprep.subr.bf16.mxu1 %v3027_v57  ;;  %v41_v57 = vld [vmem:[%s3284_s0 + $0x28] sm:$0xff] }
  0x9e   :  { %2719 = vmatpush3.bf16.msra.mxu0 %v3028_v58  ;;  %v3081_v58 = vld [vmem:[#allocation2 + $0x538] sm:$0xff]  }
  0x9f   :  { %2720 = vmatprep.subr.bf16.mxu0 %v3030_v59  ;;  %2741 = vmatpush3.bf16.msra.mxu1 %v3029_v60  ;;  %v140_v59 = vrot.slane %v41_v57, %v3186_v35  ;;  %v133_v60 = vcombine.high %v41_v57, %v41_v57 }
  0xa0   :  { %2742 = vmatprep.subr.bf16.mxu1 %v3031_v61  ;;  %v3082_v61 = vld [vmem:[#allocation2 + $0x5b8] sm:$0xff]  }
  0xa2   :  { %2721 = vmatpush3.bf16.msra.mxu0 %v3032_v62  ;;  %v148_v62 = vcombine.high %v140_v59, %v140_v59 }
  0xa3   :  { %2722 = vmatprep.subr.bf16.mxu0 %v3034_v63  ;;  %2743 = vmatpush3.bf16.msra.mxu1 %v3033_v0  ;;  %v147_v63 = vrot.slane %v133_v60, %v3186_v35  ;;  %v194_v0 = vpack.c.bf16 %v140_v59, %v140_v59 }
  0xa4   :  { %2744 = vmatprep.subr.bf16.mxu1 %v3035_v1  ;;  %v195_v1 = vpack.c.bf16 %v148_v62, %v148_v62 }
  0xa6   :  { %2723 = vmatpush3.bf16.msra.mxu0 %v3036_v2  ;;  %v149_v2 = vcombine.high %v147_v63, %v147_v63 }
  0xa7   :  { %2724 = vmatprep.subr.bf16.mxu0 %v3038_v3  ;;  %2745 = vmatpush3.bf16.msra.mxu1 %v3037_v4  ;;  %v196_v3 = vpack.c.bf16 %v147_v63, %v147_v63 }
  0xa8   :  { %2746 = vmatprep.subr.bf16.mxu1 %v3039_v5  ;;  %v197_v4 = vpack.c.bf16 %v149_v2, %v149_v2 }
  0xaa   :  { %2725 = vmatpush3.bf16.msra.mxu0 %v3040_v6  ;;  %v2344_v6 = vld [vmem:[%s3286_s2] ss:$0 sm:$0xff] }
  0xab   :  { %2726 = vmatprep.subr.bf16.mxu0 %v3042_v7  ;;  %2747 = vmatpush3.bf16.msra.mxu1 %v3041_v8 }
  0xac   :  { %2748 = vmatprep.subr.bf16.mxu1 %v3043_v9 }
  0xae   :  { %2727 = vmatpush3.bf16.msra.mxu0 %v3044_v10 }
  0xaf   :  { %2728 = vmatprep.subr.bf16.mxu0 %v3046_v11  ;;  %2749 = vmatpush3.bf16.msra.mxu1 %v3045_v12 }
  0xb0   :  { %2750 = vmatprep.subr.bf16.mxu1 %v3047_v13 }
  0xb2   :  { %2729 = vmatpush3.bf16.msra.mxu0 %v3048_v15 }
  0xb3   :  { %2758 = vmatprep.subr.bf16.mxu0 %v3051_v18  ;;  %2751 = vmatpush3.bf16.msra.mxu1 %v3049_v19  ;;  %v2223_v18 = vld [vmem:[%s3287_s3 + $0x8] sm:$0xff]  ;;  %v2224_v19 = vld [vmem:[%s3287_s3 + $0x10] sm:$0xff] }
  0xb4   :  { %2780 = vmatprep.subr.bf16.mxu1 %v3052_v23  ;;  %v2855_v21 = vpack.c.bf16 %v2223_v18, %v2222_v17 }
  0xb5   :  { %2094 = vmatmul.mubr.bf16.vlgmr.msra.gmra.mrb[16].mxu0 %v190_v22  ;;  %v2225_v22 = vld [vmem:[%s3287_s3 + $0x18] sm:$0xff] }
  0xb6   :  { %2759 = vmatpush3.bf16.msra.mxu0 %v3053_v26  ;;  %2134 = vmatmul.mubr.bf16.vlgmr.msra.gmra.mrb[16].mxu1 %v192_v27  ;;  %v2858_v23 = vpack.c.bf16 %v2225_v22, %v2224_v19  ;;  %v2861_v26 = vpack.c.bf16 %v2227_v25, %v2226_v24  ;;  %v2228_v27 = vld [vmem:[%s3287_s3 + $0x30] sm:$0xff] }
  0xb7   :  { %2760 = vmatprep.subr.bf16.mxu0 %v3055_v28  ;;  %2781 = vmatpush3.bf16.msra.mxu1 %v3054_v30  ;;  %v2229_v28 = vld [vmem:[%s3287_s3 + $0x38] sm:$0xff]  ;;  %v2230_v30 = vld [vmem:[%s3287_s3 + $0x40] sm:$0xff] }
  0xb8   :  { %2782 = vmatprep.subr.bf16.mxu1 %v3056_v31  ;;  %2173 = vmatprep.mubr.bf16.mxu0 %v195_v1  ;;  %v2864_v29 = vpack.c.bf16 %v2229_v28, %v2228_v27  ;;  %v2231_v31 = vld [vmem:[%s3287_s3 + $0x48] sm:$0xff] }
  0xb9   :  { %2213 = vmatprep.mubr.bf16.mxu1 %v197_v4 }
  0xba   :  { %2761 = vmatpush3.bf16.msra.mxu0 %v3057_v32  ;;  %v2867_v32 = vpack.c.bf16 %v2231_v31, %v2230_v30 }
  0xbb   :  { %2762 = vmatprep.subr.bf16.mxu0 %v3059_v33  ;;  %2783 = vmatpush3.bf16.msra.mxu1 %v3058_v34  ;;  %v2232_v33 = vld [vmem:[%s3287_s3 + $0x50] sm:$0xff]  ;;  %v2233_v34 = vld [vmem:[%s3287_s3 + $0x58] sm:$0xff] }
  0xbc   :  { %2784 = vmatprep.subr.bf16.mxu1 %v3060_v36  ;;  %v2870_v36 = vpack.c.bf16 %v2233_v34, %v2232_v33 }
  0xbe   :  { %2763 = vmatpush3.bf16.msra.mxu0 %v3061_v37 }
  0xbf   :  { %2764 = vmatprep.subr.bf16.mxu0 %v3063_v38  ;;  %2785 = vmatpush3.bf16.msra.mxu1 %v3062_v39 }
  0xc0   :  { %2786 = vmatprep.subr.bf16.mxu1 %v3064_v40 }
  0xc2   :  { %2765 = vmatpush3.bf16.msra.mxu0 %v3065_v41 }
  0xc3   :  { %2766 = vmatprep.subr.bf16.mxu0 %v3067_v42  ;;  %2787 = vmatpush3.bf16.msra.mxu1 %v3066_v43 }
  0xc4   :  { %2788 = vmatprep.subr.bf16.mxu1 %v3068_v44  ;;  %v2234_v44 = vld [vmem:[%s3287_s3 + $0x60] sm:$0xff] }
  0xc6   :  { %2767 = vmatpush3.bf16.msra.mxu0 %v3069_v45  ;;  %v2235_v45 = vld [vmem:[%s3287_s3 + $0x68] sm:$0xff] }
  0xc7   :  { %2768 = vmatprep.subr.bf16.mxu0 %v3071_v46  ;;  %2789 = vmatpush3.bf16.msra.mxu1 %v3070_v47 }
  0xc8   :  { %2790 = vmatprep.subr.bf16.mxu1 %v3072_v48 }
  0xca   :  { %2769 = vmatpush3.bf16.msra.mxu0 %v3073_v49  ;;  %v2873_v49 = vpack.c.bf16 %v2235_v45, %v2234_v44 }
  0xcb   :  { %2770 = vmatprep.subr.bf16.mxu0 %v3075_v50  ;;  %2791 = vmatpush3.bf16.msra.mxu1 %v3074_v51 }
  0xcc   :  { %2792 = vmatprep.subr.bf16.mxu1 %v3076_v52  ;;  %v2236_v52 = vld [vmem:[%s3287_s3 + $0x70] sm:$0xff] }
  0xce   :  { %2771 = vmatpush3.bf16.msra.mxu0 %v3077_v53  ;;  %v2237_v53 = vld [vmem:[%s3287_s3 + $0x78] sm:$0xff] }
  0xcf   :  { %2772 = vmatprep.subr.bf16.mxu0 %v3079_v54  ;;  %2793 = vmatpush3.bf16.msra.mxu1 %v3078_v55  ;;  %v2876_v54 = vpack.c.bf16 %v2237_v53, %v2236_v52  ;;  %v3142_v55 = vmov 0.0  }
  0xd0   :  { %2794 = vmatprep.subr.bf16.mxu1 %v3080_v56 }
  0xd2   :  { %2773 = vmatpush3.bf16.msra.mxu0 %v3081_v58 }
  0xd3   :  { %2795 = vmatpush3.bf16.msra.mxu1 %v3082_v61  ;;  %2854 = vmatprep.subr.bf16.mxu0 %v3140_v20 }
  0xd5   :  { %2174 = vmatmul.mubr.bf16.vlgmr.msra.gmra.mrb[20].mxu0 %v194_v0 }
  0xd6   :  { %2214 = vmatmul.mubr.bf16.vlgmr.msra.gmra.mrb[20].mxu1 %v196_v3  ;;  %2856 = vmatpush3.bf16.msra.mxu0 %v2855_v21 }
  0xd7   :  { %2857 = vmatprep.subr.bf16.mxu0 %v3140_v20  ;;  %2851 = vmatprep.mubr.msk.f32.mxu0 %vm3141_vm0, %v3142_v55 }
  0xda   :  { %2859 = vmatpush3.bf16.msra.mxu0 %v2858_v23 }
  0xdb   :  { %2860 = vmatprep.subr.bf16.mxu0 %v3140_v20 }
  0xde   :  { %2862 = vmatpush3.bf16.msra.mxu0 %v2861_v26 }
  0xdf   :  { %2863 = vmatprep.subr.bf16.mxu0 %v3140_v20 }
  0xe2   :  { %2865 = vmatpush3.bf16.msra.mxu0 %v2864_v29 }
  0xe3   :  { %2866 = vmatprep.subr.bf16.mxu0 %v3140_v20 }
  0xe6   :  { %2868 = vmatpush3.bf16.msra.mxu0 %v2867_v32 }
  0xe7   :  { %2869 = vmatprep.subr.bf16.mxu0 %v3140_v20 }
  0xea   :  { %2871 = vmatpush3.bf16.msra.mxu0 %v2870_v36 }
  0xeb   :  { %2872 = vmatprep.subr.bf16.mxu0 %v3140_v20 }
  0xee   :  { %2874 = vmatpush3.bf16.msra.mxu0 %v2873_v49 }
  0xef   :  { %2875 = vmatprep.subr.bf16.mxu0 %v3140_v20 }
  0xf2   :  { %2877 = vmatpush3.bf16.msra.mxu0 %v2876_v54 }
 0x108   :  { %v2554_v5 = vpop.f32.mrb[0].mxu0 }
 0x109   :  { %v2555_v7 = vpop.f32.mrb[1].mxu0  ;;  %v2576_v8 = vpop.f32.mrb[0].mxu1 }
 0x10a   :  { %v2556_v35 = vadd.f32 %v2555_v7, %v2554_v5  ;;  %v2557_v9 = vpop.f32.mrb[2].mxu0  ;;  %v2577_v10 = vpop.f32.mrb[1].mxu1 }
 0x10b   :  { %v2558_v11 = vpop.f32.mrb[3].mxu0  ;;  %v2578_v13 = vadd.f32 %v2577_v10, %v2576_v8  ;;  %v2579_v14 = vpop.f32.mrb[2].mxu1 }
 0x10c   :  { %v1776_v12 = vadd.f32 %v2556_v35, %v2344_v6  ;;  %v2580_v15 = vpop.f32.mrb[3].mxu1 }
 0x10e   :  { %v1816_v16 = vadd.f32 %v2578_v13, %v1776_v12 }
 0x128   :  { %v2598_v37 = vpop.f32.mrb[4].mxu0 }
 0x129   :  { %v2599_v38 = vpop.f32.mrb[5].mxu0  ;;  %v2620_v39 = vpop.f32.mrb[4].mxu1 }
 0x12a   :  { %v2600_v40 = vadd.f32 %v2599_v38, %v2598_v37  ;;  %v2601_v41 = vpop.f32.mrb[6].mxu0  ;;  %v2621_v42 = vpop.f32.mrb[5].mxu1 }
 0x12b   :  { %v2602_v43 = vpop.f32.mrb[7].mxu0  ;;  %v2622_v47 = vadd.f32 %v2621_v42, %v2620_v39  ;;  %v2623_v48 = vpop.f32.mrb[6].mxu1  ;;  %v2537_v41 = vld [vmem:[%s3288_s4] ss:$0 sm:$0xff]  ;;  %s3110_s4 = scalar_lea.vmem %s2336_s24, 32 }
 0x12c   :  { %v1856_v46 = vadd.f32 %v2600_v40, %v1816_v16  ;;  %v2624_v50 = vpop.f32.mrb[7].mxu1  ;;  %p3111_p8 = scmp.ne.s32.totalorder %s2336_s24, %s3110_s4  ;;  %p3116_p10 = scmp.lt.s32.totalorder %s3110_s4, %s3110_s4 }
 0x12e   :  { %v1896_v51 = vadd.f32 %v2622_v47, %v1856_v46  ;;  %p3117_p11 = por %p3116_p10, %p3115_p9 }
 0x130   :  { %p3118_p12 = pnand %p3117_p11, %p3111_p8 }
 0x148   :  { %v2642_v56 = vpop.f32.mrb[8].mxu0 }
 0x149   :  { %v2643_v57 = vpop.f32.mrb[9].mxu0  ;;  %v2664_v58 = vpop.f32.mrb[8].mxu1 }
 0x14a   :  { %v2644_v59 = vadd.f32 %v2643_v57, %v2642_v56  ;;  %v2645_v60 = vpop.f32.mrb[10].mxu0  ;;  %v2665_v61 = vpop.f32.mrb[9].mxu1 }
 0x14b   :  { %v2646_v62 = vpop.f32.mrb[11].mxu0  ;;  %v2666_v0 = vadd.f32 %v2665_v61, %v2664_v58  ;;  %v2667_v1 = vpop.f32.mrb[10].mxu1 }
 0x14c   :  { %v1936_v63 = vadd.f32 %v2644_v59, %v1896_v51  ;;  %v2668_v2 = vpop.f32.mrb[11].mxu1 }
 0x14e   :  { %v1976_v3 = vadd.f32 %v2666_v0, %v1936_v63 }
 0x168   :  { %v2686_v4 = vpop.f32.mrb[12].mxu0 }
 0x169   :  { %v2687_v5 = vpop.f32.mrb[13].mxu0  ;;  %v2708_v6 = vpop.f32.mrb[12].mxu1 }
 0x16a   :  { %v2688_v7 = vadd.f32 %v2687_v5, %v2686_v4  ;;  %v2689_v8 = vpop.f32.mrb[14].mxu0  ;;  %v2709_v35 = vpop.f32.mrb[13].mxu1 }
 0x16b   :  { %v2690_v9 = vpop.f32.mrb[15].mxu0  ;;  %v2710_v11 = vadd.f32 %v2709_v35, %v2708_v6  ;;  %v2711_v12 = vpop.f32.mrb[14].mxu1 }
 0x16c   :  { %v2016_v10 = vadd.f32 %v2688_v7, %v1976_v3  ;;  %v2712_v13 = vpop.f32.mrb[15].mxu1 }
 0x16e   :  { %v2056_v14 = vadd.f32 %v2710_v11, %v2016_v10 }
 0x188   :  { %v2730_v15 = vpop.f32.mrb[16].mxu0 }
 0x189   :  { %v2731_v16 = vpop.f32.mrb[17].mxu0  ;;  %v2752_v17 = vpop.f32.mrb[16].mxu1 }
 0x18a   :  { %v2732_v18 = vadd.f32 %v2731_v16, %v2730_v15  ;;  %v2733_v19 = vpop.f32.mrb[18].mxu0  ;;  %v2753_v20 = vpop.f32.mrb[17].mxu1 }
 0x18b   :  { %v2734_v21 = vpop.f32.mrb[19].mxu0  ;;  %v2754_v23 = vadd.f32 %v2753_v20, %v2752_v17  ;;  %v2755_v24 = vpop.f32.mrb[18].mxu1 }
 0x18c   :  { %v2096_v22 = vadd.f32 %v2732_v18, %v2056_v14  ;;  %v2756_v25 = vpop.f32.mrb[19].mxu1 }
 0x18e   :  { %v2136_v26 = vadd.f32 %v2754_v23, %v2096_v22 }
 0x1a8   :  { %v2774_v27 = vpop.f32.mrb[20].mxu0 }
 0x1a9   :  { %v2775_v28 = vpop.f32.mrb[21].mxu0  ;;  %v2796_v29 = vpop.f32.mrb[20].mxu1 }
 0x1aa   :  { %v2776_v30 = vadd.f32 %v2775_v28, %v2774_v27  ;;  %v2777_v31 = vpop.f32.mrb[22].mxu0  ;;  %v2797_v32 = vpop.f32.mrb[21].mxu1 }
 0x1ab   :  { %v2778_v33 = vpop.f32.mrb[23].mxu0  ;;  %v2798_v36 = vadd.f32 %v2797_v32, %v2796_v29  ;;  %v2799_v37 = vpop.f32.mrb[22].mxu1 }
 0x1ac   :  { %v2176_v34 = vadd.f32 %v2776_v30, %v2136_v26  ;;  %v2800_v38 = vpop.f32.mrb[23].mxu1 }
 0x1ae   :  { %v2216_v39 = vadd.f32 %v2798_v36, %v2176_v34 }
 0x1b0   :  { %v2221_v40 = vmax.f32 %v2216_v39, 0.0 }
 0x1b2   :  { %2852 = vmatmul.mubr.f32.vlgmr.msra.gmra.mrb[24].mxu0 %v2221_v40 }
 0x285   :  { %v2311_v42 = vpop.f32.mrb[24].mxu0 }
 0x286   :  { %v2312_v43 = vadd.f32 %v2537_v41, %v2311_v42  ;;  %v2853_v44 = vpop.f32.mrb[25].mxu0 }
 0x288   :  { %v2316_v45 = vsel %vm2315_vm1, %v2312_v43, -inf }
 0x289   :  { %2317 = vmax.xlane.f32.xlu0 %v2316_v45 }
 0x316   :  { %v2318_v46 = vpop.xlane.xlu0 %2317 }
 0x317   :  { %v2319_v47 = vsub.f32 %v2312_v43, %v2318_v46 }
 0x319   :  { %v2320_v48 = vmul.f32 1.442695, %v2319_v47 }
 0x31b   :  { %3084 = vpow2.f32 %v2320_v48 }
 0x325   :  { %v3085_v49 = vpop.eup %3084 }
 0x326   :  { %v2322_v50 = vsel %vm2315_vm1, %v3085_v49, 0.0 }
 0x327   :  { %2323 = vadd.xlane.f32.xlu0 %v2322_v50 }
 0x3b4   :  { %v2324_v51 = vpop.xlane.xlu0 %2323 }
 0x3b5   :  { %3086 = vlog2.f32 %v2324_v51 }
 0x3bf   :  { %v3087_v52 = vpop.eup %3086 }
 0x3c0   :  { %v2326_v53 = vmul.f32 0.6931472, %v3087_v52 }
 0x3c2   :  { %v2327_v54 = vsub.f32 %v2319_v47, %v2326_v53 }
 0x3c4   :  { %2328 = vst [vmem:[#allocation5] sm:$0x3] %v2327_v54 }
 0x3c5   :  { %3121 = shalt.err (!%p3118_p12)
}
 0x3c6   :  { %s3122_s27 = scalar_lea.hbm %s3289_s5, 32 }
 0x3c7   :  { %p3123_p13 = scmp.ne.s32.totalorder %s3289_s5, %s3122_s27  ;;  %p3126_p0 = scmp.lt.u32.totalorder %s3122_s27, %s3289_s5 }
 0x3c9   :  { %p3128_p1 = pnand %p3126_p0, %p3123_p13 }
 0x3cb   :  { %3131 = shalt.err (!%p3128_p1)
}
 0x3cc   :  { %2338 = dma.vmem_to_hbm [thread:$0]  %s2336_s24, 32, %s3289_s5, [#allocation4]  }
 0x3cd   :  { %3134 = dma.done.wait [#allocation4], 32  }
 0x3ce   :  { %3135 = vsyncadd [#allocation4], 4294967264 }
 0x3cf   :  { %2342 = vsyncpa [#allocation3], 1 }
 0x3d0   :  { %2343 = vsyncpa [#allocation4], 1 }

</bundles_post_ra>
